<compile_context>
chip_gen: v5e
topology: v5e:2x2
jax: 0.10.0
libtpu: 0.0.40
codegen_flags: <defaults>
</compile_context>

<pallas_src>
import functools

import jax
import jax.numpy as jnp
from jax.experimental import pallas as pl
from jax.experimental.pallas import tpu as pltpu

IN_DIM = 18            # ColorGuesser input features
OUT_DIM = 2            # ColorGuesser output classes
MID_LAYERS = (32, 32)  # chosen mid_layers config
PAD = 128              # lane padding for hidden feature dims
NEG_SLOPE = 0.01       # nn.LeakyReLU default
MAX_TILE_B = 2048      # max batch rows per grid step (VMEM footprint ~ few MiB)
ALIGN = 16             # sublane alignment (bf16 packs 16 rows per vreg)


def _round_up(n, m):
    return ((n + m - 1) // m) * m


def _mlp_kernel(*refs, num_layers):
    """refs = (x_ref, w0, b0, w1, b1, ..., wL-1, bL-1, out_ref).

    x_ref: (TILE_B, 18) bf16; w0: (18, PAD) bf16; wi: (PAD, PAD) bf16;
    bi: (1, PAD) f32; out_ref: (TILE_B, OUT_DIM) f32.
    """
    x_ref = refs[0]
    out_ref = refs[-1]
    params = refs[1:-1]

    h = x_ref[...]  # bf16
    for i in range(num_layers):
        w = params[2 * i][...]        # bf16
        b = params[2 * i + 1][...]    # f32
        # bf16 x bf16 -> f32 accumulate on the MXU; VPU work stays f32.
        h = jnp.dot(h.astype(jnp.bfloat16), w,
                    preferred_element_type=jnp.float32) + b
        if i < num_layers - 1:
            h = jnp.maximum(h, NEG_SLOPE * h)   # LeakyReLU (mul + max)

    # Softmax over the 2 real logits only (padded last-layer columns are
    # never touched). Exact divide -> probabilities sum to 1 to fp rounding.
    logits = h[:, :OUT_DIM]
    m = jnp.max(logits, axis=-1, keepdims=True)
    e = jnp.exp(logits - m)
    out_ref[...] = (e / jnp.sum(e, axis=-1, keepdims=True)).astype(out_ref.dtype)


def pack_params(weights, biases):
    """Pad params once (hoisted out of the per-call path).

    Weights are stored bf16 (MXU operands); biases stay f32 (VPU adds).
    The first weight keeps its true fan_in (18); everything else pads to 128
    lanes. Zero padding is a correctness invariant relied on by the kernel.
    """
    packed = []
    for idx, (w, b) in enumerate(zip(weights, biases)):
        fi, fo = w.shape
        fi_pad = fi if idx == 0 else PAD
        w_p = (jnp.zeros((fi_pad, PAD), jnp.float32)
               .at[:fi, :fo].set(w.astype(jnp.float32))).astype(jnp.bfloat16)
        b_p = jnp.zeros((1, PAD), jnp.float32).at[0, :fo].set(b.astype(jnp.float32))
        packed += [w_p, b_p]
    return tuple(packed)


def _choose_tiling(B, tile_b):
    """Even-split the batch: minimal padding, aligned tiles, even step count."""
    tile_b = max(ALIGN, _round_up(min(tile_b, MAX_TILE_B), ALIGN))
    n_steps = -(-B // tile_b)
    if n_steps > 1 and n_steps % 2:
        n_steps += 1                      # even steps -> balanced v7x TC split
    tile = _round_up(-(-B // n_steps), ALIGN)
    return tile, n_steps * tile


@functools.partial(jax.jit, static_argnames=("tile_b",))
def color_guesser_forward(x, packed, tile_b=MAX_TILE_B):
    """x: (B, 18).  packed: output of pack_params.  Returns (B, 2) softmax probs."""
    B = x.shape[0]
    num_layers = len(packed) // 2

    tile, B_pad = _choose_tiling(B, tile_b)

    # Fuse the bf16 cast with (optional) batch padding; skip the pad copy when
    # the batch is already aligned.
    x_bf = x.astype(jnp.bfloat16)
    if B_pad != B:
        x_bf = jnp.pad(x_bf, ((0, B_pad - B), (0, 0)))

    in_specs = [pl.BlockSpec((tile, IN_DIM), lambda i: (i, 0))]
    for p in packed:
        # Constant block index -> param stays VMEM-resident across the grid.
        in_specs.append(pl.BlockSpec(p.shape, lambda i: (0, 0)))
    out_spec = pl.BlockSpec((tile, OUT_DIM), lambda i: (i, 0))

    kernel = functools.partial(_mlp_kernel, num_layers=num_layers)

    out = pl.pallas_call(
        kernel,
        out_shape=jax.ShapeDtypeStruct((B_pad, OUT_DIM), jnp.float32),
        grid=(B_pad // tile,),
        in_specs=in_specs,
        out_specs=out_spec,
        compiler_params=pltpu.CompilerParams(
            dimension_semantics=("parallel",),   # shard batch tiles across TCs
        ),
    )(x_bf, *packed)

    return out[:B]


def _init_params(key, mid_layers):
    """Deterministic synthetic init matching ColorGuesser layer shapes."""
    dims = [IN_DIM, *mid_layers, OUT_DIM]
    weights, biases = [], []
    for i in range(len(dims) - 1):
        key, kw, kb = jax.random.split(key, 3)
        fan_in, fan_out = dims[i], dims[i + 1]
        bound = 1.0 / jnp.sqrt(fan_in)
        weights.append(jax.random.uniform(kw, (fan_in, fan_out), jnp.float32, -bound, bound))
        biases.append(jax.random.uniform(kb, (fan_out,), jnp.float32, -bound, bound))
    return weights, biases


def _reference_forward(x, weights, biases):
    """Pure-JAX f32 reference mirroring the PyTorch module."""
    h = x.astype(jnp.float32)
    n = len(weights)
    for i in range(n):
        h = h @ weights[i] + biases[i]
        if i < n - 1:
            h = jnp.where(h > 0, h, NEG_SLOPE * h)
    return jax.nn.softmax(h, axis=-1)


if __name__ == "__main__":
    key = jax.random.PRNGKey(0)
    key, kx, kx2 = jax.random.split(key, 3)

    weights, biases = _init_params(key, MID_LAYERS)
    packed = pack_params(weights, biases)   # padded once, reused every call

    # bf16 matmul operands with f32 accumulation -> ~1e-2 tolerance vs f32 ref;
    # normalization is exact (plain divide) up to fp rounding.
    # Small batch (single grid step).
    B = 8
    x = jax.random.normal(kx, (B, IN_DIM), jnp.float32)
    out = jax.block_until_ready(color_guesser_forward(x, packed))
    ref = _reference_forward(x, weights, biases)
    assert out.shape == (B, OUT_DIM)
    assert jnp.allclose(out, ref, atol=1e-2, rtol=1e-2), (out, ref)
    assert jnp.allclose(out.sum(-1), jnp.ones((B,)), atol=1e-4)

    # Larger / ragged batch exercising the multi-step parallel grid pipeline.
    B2 = 200
    x2 = jax.random.normal(kx2, (B2, IN_DIM), jnp.float32)
    out2 = jax.block_until_ready(color_guesser_forward(x2, packed, tile_b=64))
    ref2 = _reference_forward(x2, weights, biases)
    assert out2.shape == (B2, OUT_DIM)
    assert jnp.allclose(out2, ref2, atol=1e-2, rtol=1e-2)
    assert jnp.allclose(out2.sum(-1), jnp.ones((B2,)), atol=1e-4)

    print("KERNEL_OK")
</pallas_src>

<mosaic_0001>
module attributes {stable_mosaic.version = 11 : i64} {
  func.func @_mlp_kernel(%arg0: i32, %arg1: memref<16x18xbf16, #tpu.memory_space<vmem>>, %arg2: memref<18x128xbf16, #tpu.memory_space<vmem>>, %arg3: memref<1x128xf32, #tpu.memory_space<vmem>>, %arg4: memref<128x128xbf16, #tpu.memory_space<vmem>>, %arg5: memref<1x128xf32, #tpu.memory_space<vmem>>, %arg6: memref<128x128xbf16, #tpu.memory_space<vmem>>, %arg7: memref<1x128xf32, #tpu.memory_space<vmem>>, %arg8: memref<16x2xf32, #tpu.memory_space<vmem>>) attributes {dimension_semantics = [#tpu.dimension_semantics<parallel>], iteration_bounds = array<i64: 1>, scalar_prefetch = 0 : i64, scratch_operands = 0 : i64, tpu.core_type = #tpu.core_type<tc>, window_params = [{transform_indices = @transform_0, window_bounds = array<i64: 16, 18>}, {pipeline_mode = #tpu.pipeline_mode<synchronous>, transform_indices = @transform_1, window_bounds = array<i64: 18, 128>}, {pipeline_mode = #tpu.pipeline_mode<synchronous>, transform_indices = @transform_2, window_bounds = array<i64: 1, 128>}, {pipeline_mode = #tpu.pipeline_mode<synchronous>, transform_indices = @transform_3, window_bounds = array<i64: 128, 128>}, {pipeline_mode = #tpu.pipeline_mode<synchronous>, transform_indices = @transform_4, window_bounds = array<i64: 1, 128>}, {pipeline_mode = #tpu.pipeline_mode<synchronous>, transform_indices = @transform_5, window_bounds = array<i64: 128, 128>}, {pipeline_mode = #tpu.pipeline_mode<synchronous>, transform_indices = @transform_6, window_bounds = array<i64: 1, 128>}, {transform_indices = @transform_7, window_bounds = array<i64: 16, 2>}]} {
    %c0 = arith.constant 0 : index
    %c0_0 = arith.constant 0 : index
    %0 = vector.load %arg1[%c0, %c0_0] : memref<16x18xbf16, #tpu.memory_space<vmem>>, vector<16x18xbf16>
    %c0_1 = arith.constant 0 : index
    %c0_2 = arith.constant 0 : index
    %1 = vector.load %arg2[%c0_1, %c0_2] : memref<18x128xbf16, #tpu.memory_space<vmem>>, vector<18x128xbf16>
    %c0_3 = arith.constant 0 : index
    %c0_4 = arith.constant 0 : index
    %2 = vector.load %arg3[%c0_3, %c0_4] : memref<1x128xf32, #tpu.memory_space<vmem>>, vector<1x128xf32>
    %cst = arith.constant dense<0.000000e+00> : vector<16x128xf32>
    %3 = tpu.matmul %0, %1, %cst {dimension_numbers = #tpu.dot_dimension_numbers<[1], [0], [0], [1], [0, 0, 1, 1], [], []>} : vector<16x18xbf16>, vector<18x128xbf16>, vector<16x128xf32> -> vector<16x128xf32>
    %4 = vector.broadcast %2 : vector<1x128xf32> to vector<16x128xf32>
    %5 = arith.addf %3, %4 : vector<16x128xf32>
    %cst_5 = arith.constant 0.00999999977 : f32
    %6 = vector.broadcast %cst_5 : f32 to vector<16x128xf32>
    %7 = arith.mulf %6, %5 : vector<16x128xf32>
    %8 = arith.maximumf %5, %7 : vector<16x128xf32>
    %c0_6 = arith.constant 0 : index
    %c0_7 = arith.constant 0 : index
    %9 = vector.load %arg4[%c0_6, %c0_7] : memref<128x128xbf16, #tpu.memory_space<vmem>>, vector<128x128xbf16>
    %c0_8 = arith.constant 0 : index
    %c0_9 = arith.constant 0 : index
    %10 = vector.load %arg5[%c0_8, %c0_9] : memref<1x128xf32, #tpu.memory_space<vmem>>, vector<1x128xf32>
    %11 = arith.truncf %8 : vector<16x128xf32> to vector<16x128xbf16>
    %cst_10 = arith.constant dense<0.000000e+00> : vector<16x128xf32>
    %12 = tpu.matmul %11, %9, %cst_10 {dimension_numbers = #tpu.dot_dimension_numbers<[1], [0], [0], [1], [0, 0, 1, 1], [], []>} : vector<16x128xbf16>, vector<128x128xbf16>, vector<16x128xf32> -> vector<16x128xf32>
    %13 = vector.broadcast %10 : vector<1x128xf32> to vector<16x128xf32>
    %14 = arith.addf %12, %13 : vector<16x128xf32>
    %cst_11 = arith.constant 0.00999999977 : f32
    %15 = vector.broadcast %cst_11 : f32 to vector<16x128xf32>
    %16 = arith.mulf %15, %14 : vector<16x128xf32>
    %17 = arith.maximumf %14, %16 : vector<16x128xf32>
    %c0_12 = arith.constant 0 : index
    %c0_13 = arith.constant 0 : index
    %18 = vector.load %arg6[%c0_12, %c0_13] : memref<128x128xbf16, #tpu.memory_space<vmem>>, vector<128x128xbf16>
    %c0_14 = arith.constant 0 : index
    %c0_15 = arith.constant 0 : index
    %19 = vector.load %arg7[%c0_14, %c0_15] : memref<1x128xf32, #tpu.memory_space<vmem>>, vector<1x128xf32>
    %20 = arith.truncf %17 : vector<16x128xf32> to vector<16x128xbf16>
    %cst_16 = arith.constant dense<0.000000e+00> : vector<16x128xf32>
    %21 = tpu.matmul %20, %18, %cst_16 {dimension_numbers = #tpu.dot_dimension_numbers<[1], [0], [0], [1], [0, 0, 1, 1], [], []>} : vector<16x128xbf16>, vector<128x128xbf16>, vector<16x128xf32> -> vector<16x128xf32>
    %22 = vector.broadcast %19 : vector<1x128xf32> to vector<16x128xf32>
    %23 = arith.addf %21, %22 : vector<16x128xf32>
    %24 = vector.extract_strided_slice %23 {offsets = [0, 0], sizes = [16, 2], strides = [1, 1]} : vector<16x128xf32> to vector<16x2xf32>
    %cst_17 = arith.constant dense<0xFF800000> : vector<16xf32>
    %25 = vector.multi_reduction <maximumf>, %24, %cst_17 [1] : vector<16x2xf32> to vector<16xf32>
    %26 = vector.shape_cast %25 : vector<16xf32> to vector<16x1xf32>
    %27 = vector.broadcast %26 : vector<16x1xf32> to vector<16x2xf32>
    %28 = arith.subf %24, %27 : vector<16x2xf32>
    %29 = math.exp %28 : vector<16x2xf32>
    %cst_18 = arith.constant dense<0.000000e+00> : vector<16xf32>
    %30 = vector.multi_reduction <add>, %29, %cst_18 [1] : vector<16x2xf32> to vector<16xf32>
    %31 = vector.shape_cast %30 : vector<16xf32> to vector<16x1xf32>
    %32 = vector.broadcast %31 : vector<16x1xf32> to vector<16x2xf32>
    %33 = arith.divf %29, %32 : vector<16x2xf32>
    %c0_19 = arith.constant 0 : index
    %c0_20 = arith.constant 0 : index
    %34 = vector.load %arg8[%c0_19, %c0_20] : memref<16x2xf32, #tpu.memory_space<vmem>>, vector<16x2xf32>
    tpu.vector_store %arg8[%c0_19, %c0_20], %33 {strides = array<i32>} : memref<16x2xf32, #tpu.memory_space<vmem>>, vector<16x2xf32>,
    return
  }
  func.func @transform_0(%arg0: i32) -> (i32, i32) {
    %c0_i32 = arith.constant 0 : i32
    %c0_i32_0 = arith.constant 0 : i32
    return %arg0, %c0_i32 : i32, i32
  }
  func.func @transform_1(%arg0: i32) -> (i32, i32) {
    %c0_i32 = arith.constant 0 : i32
    %c0_i32_0 = arith.constant 0 : i32
    %c0_i32_1 = arith.constant 0 : i32
    return %c0_i32, %c0_i32_0 : i32, i32
  }
  func.func @transform_2(%arg0: i32) -> (i32, i32) {
    %c0_i32 = arith.constant 0 : i32
    %c0_i32_0 = arith.constant 0 : i32
    %c0_i32_1 = arith.constant 0 : i32
    return %c0_i32, %c0_i32_0 : i32, i32
  }
  func.func @transform_3(%arg0: i32) -> (i32, i32) {
    %c0_i32 = arith.constant 0 : i32
    %c0_i32_0 = arith.constant 0 : i32
    %c0_i32_1 = arith.constant 0 : i32
    return %c0_i32, %c0_i32_0 : i32, i32
  }
  func.func @transform_4(%arg0: i32) -> (i32, i32) {
    %c0_i32 = arith.constant 0 : i32
    %c0_i32_0 = arith.constant 0 : i32
    %c0_i32_1 = arith.constant 0 : i32
    return %c0_i32, %c0_i32_0 : i32, i32
  }
  func.func @transform_5(%arg0: i32) -> (i32, i32) {
    %c0_i32 = arith.constant 0 : i32
    %c0_i32_0 = arith.constant 0 : i32
    %c0_i32_1 = arith.constant 0 : i32
    return %c0_i32, %c0_i32_0 : i32, i32
  }
  func.func @transform_6(%arg0: i32) -> (i32, i32) {
    %c0_i32 = arith.constant 0 : i32
    %c0_i32_0 = arith.constant 0 : i32
    %c0_i32_1 = arith.constant 0 : i32
    return %c0_i32, %c0_i32_0 : i32, i32
  }
  func.func @transform_7(%arg0: i32) -> (i32, i32) {
    %c0_i32 = arith.constant 0 : i32
    %c0_i32_0 = arith.constant 0 : i32
    return %arg0, %c0_i32 : i32, i32
  }
}

</mosaic_0001>

<bundles_post_ra>
// kernel: color_guesser_forward.1
= control target key start
LH: loop header
LB: loop body
LE: loop exit
PB: predicated region body
PF: predicated region fallthrough
CT: control target
= control target key end

     0   :  { %12 = vsyncpa [#allocation3], 0  ;;  %s573_s0 = inlined_call_operand.vmem [shape: bf16[16,18], index: 0, kind: input, shape index: {}]   ;;  %s574_s1 = inlined_call_operand.vmem [shape: bf16[18,128], index: 1, kind: input, shape index: {}]   ;;  %s575_s2 = inlined_call_operand.vmem [shape: f32[1,128], index: 2, kind: input, shape index: {}]   ;;  %s576_s3 = inlined_call_operand.hbm [shape: bf16[128,128], index: 3, kind: input, shape index: {}]   ;;  %s577_s4 = inlined_call_operand.vmem [shape: f32[1,128], index: 4, kind: input, shape index: {}]   ;;  %s578_s5 = inlined_call_operand.hbm [shape: bf16[128,128], index: 5, kind: input, shape index: {}]   ;;  %s579_s6 = inlined_call_operand.vmem [shape: f32[1,128], index: 6, kind: input, shape index: {}]   ;;  %s580_s7 = inlined_call_operand.vmem [shape: f32[16,2], index: 7, kind: output, shape index: {}]  }
   0x1   :  { %s24_s26 = sshll.u32 %s576_s3, 4  ;;  %s25_s26 = int_to_ptr.hbm [resolvable:$true] %s24_s26 }
   0x2   :  { %13 = vsyncpa [#allocation5], 0  ;;  %s493_s27 = smov [#allocation2]   ;;  %s39_s8 = sshll.u32 %s578_s5, 4  ;;  %s40_s8 = int_to_ptr.hbm [resolvable:$true] %s39_s8 }
   0x3   :  { %s26_s28 = sshll.u32 %s493_s27, 4  ;;  %s494_s9 = smov 64   ;;  %s27_s28 = int_to_ptr.vmem [resolvable:$true] %s26_s28 }
   0x4   :  { %s495_s10 = smov 4   ;;  %s496_s11 = smov [#allocation4]  }
   0x5   :  { %32 = dma.hbm_to_vmem [thread:$0]  %s25_s26, 1024, %s27_s28, [#allocation3], %s494_s9, %s494_s9, %s495_s10  }
   0x6   :  { %s41_s12 = sshll.u32 %s496_s11, 4  ;;  %s42_s12 = int_to_ptr.vmem [resolvable:$true] %s41_s12 }
   0x7   :  { %47 = dma.hbm_to_vmem [thread:$0]  %s40_s8, 1024, %s42_s12, [#allocation5], %s494_s9, %s494_s9, %s495_s10  }
   0x8   :  { %489 = dma.done.wait [#allocation3], 1024  }
   0x9   :  { %490 = vsyncadd [#allocation3], 4294966272 }
   0xa   :  { %491 = dma.done.wait [#allocation5], 1024  }
   0xb   :  { %492 = vsyncadd [#allocation5], 4294966272  ;;  %v63_v0 = vld [vmem:[%s574_s1 + $0x8] sm:$0x1]  ;;  %v417_v2 = vld [vmem:[#allocation2 + $0x38] sm:$0xff]  ;;  %vm86_vm0 = vcmask 1040384  }
   0xc   :  { %v78_v1 = vunpack.c.l.b16 %v63_v0  ;;  %177 = vmatpush.bf16.msra.mxu1 %v417_v2  ;;  %v416_v4 = vld [vmem:[#allocation2 + $0x30] sm:$0xff]  ;;  %v409_v6 = vld [vmem:[%s574_s1] sm:$0xff]  ;;  %v415_v7 = vld [vmem:[#allocation2 + $0x28] sm:$0xff]  ;;  %vm82_vm1 = vcmask 146432   ;;  %vm278_vm2 = vcmask 15360  }
   0xd   :  { %v408_v8 = vld [vmem:[%s573_s0] sm:$0xff]  ;;  %v413_v10 = vld [vmem:[#allocation2 + $0x18] sm:$0xff]  ;;  %v412_v11 = vld [vmem:[#allocation2 + $0x10] sm:$0xff] }
   0xe   :  { %v80_v3 = vpack.c.b16 %v78_v1, %v78_v1  ;;  %v414_v9 = vld [vmem:[#allocation2 + $0x20] sm:$0xff]  ;;  %v411_v12 = vld [vmem:[#allocation2 + $0x8] sm:$0xff]  ;;  %v425_v14 = vld [vmem:[#allocation4 + $0x38] sm:$0xff] }
   0xf   :  { %v410_v13 = vld [vmem:[#allocation2] sm:$0xff]  ;;  %264 = vmatpush.bf16.msra.mxu2 %v425_v14  ;;  %v424_v15 = vld [vmem:[#allocation4 + $0x30] sm:$0xff]  ;;  %v423_v16 = vld [vmem:[#allocation4 + $0x28] sm:$0xff] }
  0x10   :  { %v88_v5 = vsel %vm86_vm0, %v80_v3, 0  ;;  %178 = vmatpush.bf16.msra.mxu1 %v416_v4  ;;  %v422_v17 = vld [vmem:[#allocation4 + $0x20] sm:$0xff]  ;;  %v421_v28 = vld [vmem:[#allocation4 + $0x18] sm:$0xff]  ;;  %v420_v29 = vld [vmem:[#allocation4 + $0x10] sm:$0xff] }
  0x11   :  { %96 = vmatpush.bf16.msra.mxu0 %v88_v5  ;;  %v430_v19 = vld [vmem:[%s575_s2] ss:$0 sm:$0xff]  ;;  %v419_v30 = vld [vmem:[#allocation4 + $0x8] sm:$0xff] }
  0x12   :  { %v418_v31 = vld [vmem:[#allocation4] sm:$0xff] }
  0x13   :  { %265 = vmatpush.bf16.msra.mxu2 %v424_v15  ;;  %v431_v33 = vld [vmem:[%s577_s4] ss:$0 sm:$0xff] }
  0x14   :  { %179 = vmatpush.bf16.msra.mxu1 %v415_v7  ;;  %v432_v42 = vld [vmem:[%s579_s6] ss:$0 sm:$0xff] }
  0x15   :  { %97 = vmatpush.bf16.msra.mxu0 %v409_v6 }
  0x17   :  { %266 = vmatpush.bf16.msra.mxu2 %v423_v16 }
  0x18   :  { %343 = vmatmul.msk.bf16.vlgmr.msra.gmra.mxu0 %vm82_vm1, %v408_v8  ;;  %180 = vmatpush.bf16.msra.mxu1 %v414_v9 }
  0x1b   :  { %267 = vmatpush.bf16.msra.mxu2 %v422_v17 }
  0x1c   :  { %181 = vmatpush.bf16.msra.mxu1 %v413_v10 }
  0x1f   :  { %268 = vmatpush.bf16.msra.mxu2 %v421_v28 }
  0x20   :  { %182 = vmatpush.bf16.msra.mxu1 %v412_v11 }
  0x23   :  { %269 = vmatpush.bf16.msra.mxu2 %v420_v29 }
  0x24   :  { %183 = vmatpush.bf16.msra.mxu1 %v411_v12 }
  0x27   :  { %270 = vmatpush.bf16.msra.mxu2 %v419_v30 }
  0x28   :  { %184 = vmatpush.bf16.msra.mxu1 %v410_v13 }
  0x2b   :  { %271 = vmatpush.bf16.msra.mxu2 %v418_v31 }
  0x95   :  { %v99_v18 = vpop.f32.mrf.mxu0 }
  0x96   :  { %v100_v20 = vadd.f32 %v430_v19, %v99_v18 }
  0x98   :  { %v104_v22 = vmul.f32 0.01, %v100_v20 }
  0x9a   :  { %v106_v25 = vmax.f32 %v100_v20, %v104_v22 }
  0x9d   :  { %v101_v21 = vpop.f32.mrf.mxu0 }
  0x9e   :  { %v102_v23 = vadd.f32 %v430_v19, %v101_v21 }
  0xa0   :  { %v105_v24 = vmul.f32 0.01, %v102_v23 }
  0xa2   :  { %v107_v26 = vmax.f32 %v102_v23, %v105_v24 }
  0xa4   :  { %v125_v27 = vpack.c.bf16 %v107_v26, %v106_v25 }
  0xa6   :  { %185 = vmatmul.bf16.vlgmr.msra.gmra.mxu1 %v125_v27 }
 0x123   :  { %v186_v32 = vpop.f32.mrf.mxu1 }
 0x124   :  { %v187_v34 = vadd.f32 %v431_v33, %v186_v32 }
 0x126   :  { %v191_v36 = vmul.f32 0.01, %v187_v34 }
 0x128   :  { %v193_v39 = vmax.f32 %v187_v34, %v191_v36 }
 0x12b   :  { %v188_v35 = vpop.f32.mrf.mxu1 }
 0x12c   :  { %v189_v37 = vadd.f32 %v431_v33, %v188_v35 }
 0x12e   :  { %v192_v38 = vmul.f32 0.01, %v189_v37 }
 0x130   :  { %v194_v40 = vmax.f32 %v189_v37, %v192_v38 }
 0x132   :  { %v212_v41 = vpack.c.bf16 %v194_v40, %v193_v39 }
 0x134   :  { %272 = vmatmul.bf16.vlgmr.msra.gmra.mxu2 %v212_v41 }
 0x1b7   :  { %v273_v43 = vpop.f32.mrf.mxu2 }
 0x1b8   :  { %v274_v44 = vadd.f32 %v432_v42, %v273_v43 }
 0x1ba   :  { %v279_v45 = vsel %vm278_vm2, %v274_v44, -inf }
 0x1bb   :  { %280 = vmax.xlane.f32.xlu0 %v279_v45 }
 0x1bf   :  { %v275_v46 = vpop.f32.mrf.mxu2 }
 0x1c0   :  { %v276_v47 = vadd.f32 %v432_v42, %v275_v46 }
 0x1c2   :  { %v282_v48 = vsel %vm278_vm2, %v276_v47, -inf }
 0x1c3   :  { %283 = vmax.xlane.f32.xlu0 %v282_v48 }
 0x22e   :  { %v281_v49 = vpop.xlane.xlu0 %280 }
 0x22f   :  { %v285_v50 = vsub.f32 %v274_v44, %v281_v49 }
 0x231   :  { %v287_v51 = vmul.f32 1.442695, %v285_v50 }
 0x233   :  { %433 = vpow2.f32 %v287_v51 }
 0x236   :  { %v284_v52 = vpop.xlane.xlu0 %283 }
 0x237   :  { %v286_v53 = vsub.f32 %v276_v47, %v284_v52 }
 0x239   :  { %v434_v54 = vpop.eup %433  ;;  %v289_v55 = vmul.f32 1.442695, %v286_v53 }
 0x23a   :  { %v291_v56 = vsel %vm278_vm2, %v434_v54, 0.0 }
 0x23b   :  { %435 = vpow2.f32 %v289_v55  ;;  %292 = vadd.xlane.f32.xlu1 %v291_v56 }
 0x241   :  { %v436_v57 = vpop.eup %435 }
 0x242   :  { %v294_v58 = vsel %vm278_vm2, %v436_v57, 0.0 }
 0x243   :  { %295 = vadd.xlane.f32.xlu1 %v294_v58 }
 0x2ae   :  { %v293_v59 = vpop.xlane.xlu1 %292 }
 0x2af   :  { %437 = vrcp.f32 %v293_v59  ;;  %v308_v0 = vand.u32 2147483648, %v293_v59  ;;  %v306_v2 = vand.u32 2147483647, %v293_v59  ;;  %vm302_vm4 = vweird.f32 %v293_v59 }
 0x2b1   :  { %v309_v5 = vor.u32 1.1754944e-38, %v308_v0  ;;  %vm307_vm6 = vcmp.eq.f32.partialorder %v306_v2, 8.507059e+37 }
 0x2b5   :  { %v438_v60 = vpop.eup %437 }
 0x2b6   :  { %v298_v61 = vmul.f32 %v438_v60, %v293_v59  ;;  %v296_v62 = vpop.xlane.xlu1 %295  ;;  %vm303_vm3 = vweird.f32 %v438_v60 }
 0x2b7   :  { %439 = vrcp.f32 %v296_v62  ;;  %vm304_vm5 = vmor %vm302_vm4, %vm303_vm3  ;;  %v323_v11 = vand.u32 2147483648, %v296_v62  ;;  %v321_v13 = vand.u32 2147483647, %v296_v62  ;;  %vm317_vm8 = vweird.f32 %v296_v62 }
 0x2b8   :  { %v299_v63 = vsub.f32 1.0, %v298_v61 }
 0x2b9   :  { %v324_v15 = vor.u32 1.1754944e-38, %v323_v11  ;;  %vm322_vm10 = vcmp.eq.f32.partialorder %v321_v13, 8.507059e+37 }
 0x2ba   :  { %v300_v1 = vmul.f32 %v438_v60, %v299_v63 }
 0x2bc   :  { %v301_v3 = vadd.f32 %v438_v60, %v300_v1 }
 0x2bd   :  { %v440_v4 = vpop.eup %439 }
 0x2be   :  { %v305_v6 = vsel %vm304_vm5, %v438_v60, %v301_v3  ;;  %v313_v7 = vmul.f32 %v440_v4, %v296_v62  ;;  %vm318_vm7 = vweird.f32 %v440_v4 }
 0x2bf   :  { %v310_v8 = vsel %vm307_vm6, %v309_v5, %v305_v6  ;;  %vm319_vm9 = vmor %vm317_vm8, %vm318_vm7 }
 0x2c0   :  { %v311_v9 = vmul.f32 %v434_v54, %v310_v8  ;;  %v314_v10 = vsub.f32 1.0, %v313_v7 }
 0x2c2   :  { %327 = vst.msk [vmem:[%s580_s7] sm:$0xff] %vm278_vm2, %v311_v9  ;;  %v315_v12 = vmul.f32 %v440_v4, %v314_v10 }
 0x2c4   :  { %v316_v14 = vadd.f32 %v440_v4, %v315_v12 }
 0x2c6   :  { %v320_v16 = vsel %vm319_vm9, %v440_v4, %v316_v14 }
 0x2c7   :  { %v325_v17 = vsel %vm322_vm10, %v324_v15, %v320_v16 }
 0x2c8   :  { %v326_v18 = vmul.f32 %v436_v57, %v325_v17 }
 0x2ca   :  { %328 = vst.msk [vmem:[%s580_s7 + $0x8] sm:$0xff] %vm278_vm2, %v326_v18 }
 0x2cb   :  { %333 = vsyncpa [#allocation3], 1 }
 0x2cc   :  { %334 = vsyncpa [#allocation5], 1 }

</bundles_post_ra>
